<compile_context>
chip_gen: v6e
topology: v6e:2x2x1
jax: 0.10.0
libtpu: 0.0.40
codegen_flags: <defaults>
</compile_context>

<pallas_src>
import functools

import jax
import jax.numpy as jnp
from jax.experimental import pallas as pl
from jax.experimental.pallas import tpu as pltpu


def mlp_kernel(x_ref, w1_ref, b1_ref, w2_ref, b2_ref, w3_ref, b3_ref, o_ref):
    # Layer 1: Linear(input_size -> num_hidden) + ReLU  (bf16 MXU, f32 accum)
    x = x_ref[...].astype(jnp.bfloat16)
    h1 = jnp.dot(x, w1_ref[...], preferred_element_type=jnp.float32)
    h1 = jnp.maximum(h1 + b1_ref[...], 0.0)
    # Layer 2: Linear(num_hidden -> 64) + ReLU
    h2 = jnp.dot(h1.astype(jnp.bfloat16), w2_ref[...],
                 preferred_element_type=jnp.float32)
    h2 = jnp.maximum(h2 + b2_ref[...], 0.0)
    # Layer 3: Linear(64 -> padded output), no activation; lane-dense store
    out = jnp.dot(h2.astype(jnp.bfloat16), w3_ref[...],
                  preferred_element_type=jnp.float32)
    o_ref[...] = (out + b3_ref[...]).astype(o_ref.dtype)


def _round_up(x, m):
    return ((x + m - 1) // m) * m


@functools.partial(jax.jit, static_argnames=("block_b",))
def mountain_network_forward(x, params, *, block_b=512):
    """Fused 3-layer MLP forward pass as a batch-tiled Pallas kernel.

    x: (B, input_size) float32
    params: dict of w1 (in, H1), b1 (1, H1), w2 (H1, H2), b2 (1, H2),
            w3 (H2, out), b3 (1, out)   -- all float32
    """
    w1, b1, w2, b2, w3, b3 = (params["w1"], params["b1"], params["w2"],
                              params["b2"], params["w3"], params["b3"])
    B, in_size = x.shape
    H1 = w1.shape[1]
    H2 = w2.shape[1]
    out_size = w3.shape[1]

    # Lane-dense output: pad the last layer to a multiple of 128 lanes.
    out_pad = _round_up(out_size, 128)
    w3p = jnp.zeros((H2, out_pad), w3.dtype).at[:, :out_size].set(w3)
    b3p = jnp.zeros((1, out_pad), b3.dtype).at[:, :out_size].set(b3)

    # MXU wants bf16 operands; accumulation stays f32 inside the kernel.
    w1b = w1.astype(jnp.bfloat16)
    w2b = w2.astype(jnp.bfloat16)
    w3b = w3p.astype(jnp.bfloat16)

    # Batch tile: multiple of 8 sublanes, capped by block_b; pad B up to a
    # whole number of tiles so every grid step sees a full block.
    tb = min(block_b, _round_up(B, 8))
    tb = _round_up(tb, 8)
    b_pad = _round_up(B, tb)
    if b_pad != B:
        x = jnp.pad(x, ((0, b_pad - B), (0, 0)))
    grid = (b_pad // tb,)

    resident = lambda i: (0, 0)      # weights/biases stay put across batch tiles
    batched = lambda i: (i, 0)       # x / out march down the batch axis

    flops = 2 * b_pad * (in_size * H1 + H1 * H2 + H2 * out_pad)
    bytes_accessed = (x.size * 2                      # x read (as bf16-equivalent traffic)
                      + w1b.size * 2 + w2b.size * 2 + w3b.size * 2
                      + (b1.size + b2.size + b3p.size) * 4
                      + b_pad * out_pad * 4)          # output write

    out = pl.pallas_call(
        mlp_kernel,
        out_shape=jax.ShapeDtypeStruct((b_pad, out_pad), jnp.float32),
        grid_spec=pltpu.PrefetchScalarGridSpec(
            num_scalar_prefetch=0,
            grid=grid,
            in_specs=[
                pl.BlockSpec((tb, in_size), batched),
                pl.BlockSpec((in_size, H1), resident),
                pl.BlockSpec((1, H1), resident),
                pl.BlockSpec((H1, H2), resident),
                pl.BlockSpec((1, H2), resident),
                pl.BlockSpec((H2, out_pad), resident),
                pl.BlockSpec((1, out_pad), resident),
            ],
            out_specs=pl.BlockSpec((tb, out_pad), batched),
        ),
        compiler_params=pltpu.CompilerParams(
            dimension_semantics=("parallel",),
            vmem_limit_bytes=32 * 1024 * 1024,
        ),
        cost_estimate=pl.CostEstimate(
            flops=flops, transcendentals=0, bytes_accessed=bytes_accessed),
    )(x, w1b, b1, w2b, b2, w3b, b3p)

    return out[:B, :out_size]


def init_params(key, input_size, output_size, num_hidden=128):
    """Deterministic init mimicking nn.Linear's uniform(-1/sqrt(fan_in), 1/sqrt(fan_in))."""
    def linear_init(k, fan_in, fan_out):
        kw, kb = jax.random.split(k)
        bound = 1.0 / jnp.sqrt(fan_in)
        w = jax.random.uniform(kw, (fan_in, fan_out), jnp.float32, -bound, bound)
        b = jax.random.uniform(kb, (1, fan_out), jnp.float32, -bound, bound)
        return w, b

    k1, k2, k3 = jax.random.split(key, 3)
    w1, b1 = linear_init(k1, input_size, num_hidden)
    w2, b2 = linear_init(k2, num_hidden, 64)
    w3, b3 = linear_init(k3, 64, output_size)
    return {"w1": w1, "b1": b1, "w2": w2, "b2": b2, "w3": w3, "b3": b3}


def reference_forward(x, p):
    h1 = jnp.maximum(x @ p["w1"] + p["b1"], 0.0)
    h2 = jnp.maximum(h1 @ p["w2"] + p["b2"], 0.0)
    return h2 @ p["w3"] + p["b3"]


if __name__ == "__main__":
    key = jax.random.PRNGKey(0)
    k_param, k_x = jax.random.split(key)

    # MountainCar-like small shapes: batch=8, state dim=4, 3 actions.
    # NOTE: at this toy size the kernel is pure launch overhead; the grid/tiling
    # only pays off once B is in the thousands (see block_b).
    batch, input_size, output_size, num_hidden = 8, 4, 3, 128

    params = init_params(k_param, input_size, output_size, num_hidden)
    x = jax.random.normal(k_x, (batch, input_size), jnp.float32)

    out = mountain_network_forward(x, params)
    out = jax.block_until_ready(out)

    ref = reference_forward(x, params)
    assert out.shape == (batch, output_size)
    # bf16 MXU operands with f32 accumulation -> relaxed tolerance vs f32 reference.
    assert jnp.allclose(out, ref, atol=2e-2, rtol=2e-2), "mismatch vs JAX reference"

    print("KERNEL_OK")
</pallas_src>

<mosaic_0001>
module attributes {stable_mosaic.version = 11 : i64} {
  func.func @mlp_kernel(%arg0: i32, %arg1: memref<8x4xf32, #tpu.memory_space<vmem>>, %arg2: memref<4x128xbf16, #tpu.memory_space<vmem>>, %arg3: memref<1x128xf32, #tpu.memory_space<vmem>>, %arg4: memref<128x64xbf16, #tpu.memory_space<vmem>>, %arg5: memref<1x64xf32, #tpu.memory_space<vmem>>, %arg6: memref<64x128xbf16, #tpu.memory_space<vmem>>, %arg7: memref<1x128xf32, #tpu.memory_space<vmem>>, %arg8: memref<8x128xf32, #tpu.memory_space<vmem>>) attributes {dimension_semantics = [#tpu.dimension_semantics<parallel>], iteration_bounds = array<i64: 1>, scalar_prefetch = 0 : i64, scratch_operands = 0 : i64, tpu.core_type = #tpu.core_type<tc>, window_params = [{transform_indices = @transform_0, window_bounds = array<i64: 8, 4>}, {pipeline_mode = #tpu.pipeline_mode<synchronous>, transform_indices = @transform_1, window_bounds = array<i64: 4, 128>}, {pipeline_mode = #tpu.pipeline_mode<synchronous>, transform_indices = @transform_2, window_bounds = array<i64: 1, 128>}, {pipeline_mode = #tpu.pipeline_mode<synchronous>, transform_indices = @transform_3, window_bounds = array<i64: 128, 64>}, {pipeline_mode = #tpu.pipeline_mode<synchronous>, transform_indices = @transform_4, window_bounds = array<i64: 1, 64>}, {pipeline_mode = #tpu.pipeline_mode<synchronous>, transform_indices = @transform_5, window_bounds = array<i64: 64, 128>}, {pipeline_mode = #tpu.pipeline_mode<synchronous>, transform_indices = @transform_6, window_bounds = array<i64: 1, 128>}, {transform_indices = @transform_7, window_bounds = array<i64: 8, 128>}]} {
    %c0 = arith.constant 0 : index
    %c0_0 = arith.constant 0 : index
    %0 = vector.load %arg1[%c0, %c0_0] : memref<8x4xf32, #tpu.memory_space<vmem>>, vector<8x4xf32>
    %1 = arith.truncf %0 : vector<8x4xf32> to vector<8x4xbf16>
    %c0_1 = arith.constant 0 : index
    %c0_2 = arith.constant 0 : index
    %2 = vector.load %arg2[%c0_1, %c0_2] : memref<4x128xbf16, #tpu.memory_space<vmem>>, vector<4x128xbf16>
    %cst = arith.constant dense<0.000000e+00> : vector<8x128xf32>
    %3 = tpu.matmul %1, %2, %cst {dimension_numbers = #tpu.dot_dimension_numbers<[1], [0], [0], [1], [0, 0, 1, 1], [], []>} : vector<8x4xbf16>, vector<4x128xbf16>, vector<8x128xf32> -> vector<8x128xf32>
    %c0_3 = arith.constant 0 : index
    %c0_4 = arith.constant 0 : index
    %4 = vector.load %arg3[%c0_3, %c0_4] : memref<1x128xf32, #tpu.memory_space<vmem>>, vector<1x128xf32>
    %5 = vector.broadcast %4 : vector<1x128xf32> to vector<8x128xf32>
    %6 = arith.addf %3, %5 : vector<8x128xf32>
    %cst_5 = arith.constant 0.000000e+00 : f32
    %7 = vector.broadcast %cst_5 : f32 to vector<8x128xf32>
    %8 = arith.maximumf %6, %7 : vector<8x128xf32>
    %9 = arith.truncf %8 : vector<8x128xf32> to vector<8x128xbf16>
    %c0_6 = arith.constant 0 : index
    %c0_7 = arith.constant 0 : index
    %10 = vector.load %arg4[%c0_6, %c0_7] : memref<128x64xbf16, #tpu.memory_space<vmem>>, vector<128x64xbf16>
    %cst_8 = arith.constant dense<0.000000e+00> : vector<8x64xf32>
    %11 = tpu.matmul %9, %10, %cst_8 {dimension_numbers = #tpu.dot_dimension_numbers<[1], [0], [0], [1], [0, 0, 1, 1], [], []>} : vector<8x128xbf16>, vector<128x64xbf16>, vector<8x64xf32> -> vector<8x64xf32>
    %c0_9 = arith.constant 0 : index
    %c0_10 = arith.constant 0 : index
    %12 = vector.load %arg5[%c0_9, %c0_10] : memref<1x64xf32, #tpu.memory_space<vmem>>, vector<1x64xf32>
    %13 = vector.broadcast %12 : vector<1x64xf32> to vector<8x64xf32>
    %14 = arith.addf %11, %13 : vector<8x64xf32>
    %cst_11 = arith.constant 0.000000e+00 : f32
    %15 = vector.broadcast %cst_11 : f32 to vector<8x64xf32>
    %16 = arith.maximumf %14, %15 : vector<8x64xf32>
    %17 = arith.truncf %16 : vector<8x64xf32> to vector<8x64xbf16>
    %c0_12 = arith.constant 0 : index
    %c0_13 = arith.constant 0 : index
    %18 = vector.load %arg6[%c0_12, %c0_13] : memref<64x128xbf16, #tpu.memory_space<vmem>>, vector<64x128xbf16>
    %cst_14 = arith.constant dense<0.000000e+00> : vector<8x128xf32>
    %19 = tpu.matmul %17, %18, %cst_14 {dimension_numbers = #tpu.dot_dimension_numbers<[1], [0], [0], [1], [0, 0, 1, 1], [], []>} : vector<8x64xbf16>, vector<64x128xbf16>, vector<8x128xf32> -> vector<8x128xf32>
    %c0_15 = arith.constant 0 : index
    %c0_16 = arith.constant 0 : index
    %20 = vector.load %arg7[%c0_15, %c0_16] : memref<1x128xf32, #tpu.memory_space<vmem>>, vector<1x128xf32>
    %21 = vector.broadcast %20 : vector<1x128xf32> to vector<8x128xf32>
    %22 = arith.addf %19, %21 : vector<8x128xf32>
    %c0_17 = arith.constant 0 : index
    %c0_18 = arith.constant 0 : index
    %23 = vector.load %arg8[%c0_17, %c0_18] : memref<8x128xf32, #tpu.memory_space<vmem>>, vector<8x128xf32>
    tpu.vector_store %arg8[%c0_17, %c0_18], %22 {strides = array<i32>} : memref<8x128xf32, #tpu.memory_space<vmem>>, vector<8x128xf32>,
    return
  }
  func.func @transform_0(%arg0: i32) -> (i32, i32) {
    %c0_i32 = arith.constant 0 : i32
    %c0_i32_0 = arith.constant 0 : i32
    return %arg0, %c0_i32 : i32, i32
  }
  func.func @transform_1(%arg0: i32) -> (i32, i32) {
    %c0_i32 = arith.constant 0 : i32
    %c0_i32_0 = arith.constant 0 : i32
    %c0_i32_1 = arith.constant 0 : i32
    return %c0_i32, %c0_i32_0 : i32, i32
  }
  func.func @transform_2(%arg0: i32) -> (i32, i32) {
    %c0_i32 = arith.constant 0 : i32
    %c0_i32_0 = arith.constant 0 : i32
    %c0_i32_1 = arith.constant 0 : i32
    return %c0_i32, %c0_i32_0 : i32, i32
  }
  func.func @transform_3(%arg0: i32) -> (i32, i32) {
    %c0_i32 = arith.constant 0 : i32
    %c0_i32_0 = arith.constant 0 : i32
    %c0_i32_1 = arith.constant 0 : i32
    return %c0_i32, %c0_i32_0 : i32, i32
  }
  func.func @transform_4(%arg0: i32) -> (i32, i32) {
    %c0_i32 = arith.constant 0 : i32
    %c0_i32_0 = arith.constant 0 : i32
    %c0_i32_1 = arith.constant 0 : i32
    return %c0_i32, %c0_i32_0 : i32, i32
  }
  func.func @transform_5(%arg0: i32) -> (i32, i32) {
    %c0_i32 = arith.constant 0 : i32
    %c0_i32_0 = arith.constant 0 : i32
    %c0_i32_1 = arith.constant 0 : i32
    return %c0_i32, %c0_i32_0 : i32, i32
  }
  func.func @transform_6(%arg0: i32) -> (i32, i32) {
    %c0_i32 = arith.constant 0 : i32
    %c0_i32_0 = arith.constant 0 : i32
    %c0_i32_1 = arith.constant 0 : i32
    return %c0_i32, %c0_i32_0 : i32, i32
  }
  func.func @transform_7(%arg0: i32) -> (i32, i32) {
    %c0_i32 = arith.constant 0 : i32
    %c0_i32_0 = arith.constant 0 : i32
    return %arg0, %c0_i32 : i32, i32
  }
}

</mosaic_0001>

<bundles_post_ra>
// kernel: mountain_network_forward.1
= control target key start
LH: loop header
LB: loop body
LE: loop exit
PB: predicated region body
PF: predicated region fallthrough
CT: control target
= control target key end

     0   :  { %vm41_vm0 = vcmask 1041408   ;;  %v373_v0 = vmov 0.0   ;;  %vm374_vm1 = vmmov 0   ;;  %vm37_vm2 = vcmask 31744   ;;  %s472_s1 = inlined_call_operand.vmem [shape: bf16[4,128], index: 1, kind: input, shape index: {}]   ;;  %s473_s0 = inlined_call_operand.vmem [shape: f32[8,4], index: 0, kind: input, shape index: {}]   ;;  %s474_s3 = inlined_call_operand.vmem [shape: bf16[128,64], index: 3, kind: input, shape index: {}]   ;;  %s475_s5 = inlined_call_operand.vmem [shape: bf16[64,128], index: 5, kind: input, shape index: {}]   ;;  %s476_s2 = inlined_call_operand.vmem [shape: f32[1,128], index: 2, kind: input, shape index: {}]   ;;  %s477_s4 = inlined_call_operand.vmem [shape: f32[1,64], index: 4, kind: input, shape index: {}]   ;;  %s478_s6 = inlined_call_operand.vmem [shape: f32[1,128], index: 6, kind: input, shape index: {}]   ;;  %s479_s7 = inlined_call_operand.vmem [shape: f32[8,128], index: 7, kind: output, shape index: {}]  }
   0x1   :  { %321 = vmatprep.subr.bf16.mxu0 %v373_v0  ;;  %v29_v1 = vld [vmem:[%s472_s1] sm:$0x3]  ;;  %323 = vmatprep.mubr.msk.bf16.mxu0 %vm374_vm1, %v373_v0  ;;  %v361_v5 = vld [vmem:[%s474_s3 + $0x38] sm:$0xff]   ;;  %v362_v6 = vld [vmem:[%s474_s3 + $0x30] sm:$0xff]   ;;  %vm239_vm3 = vcmask 523264  }
   0x2   :  { %v27_v2 = vld [vmem:[%s473_s0] sm:$0xff]  ;;  %v43_v3 = vsel %vm41_vm0, %v29_v1, 0  ;;  %327 = vmatprep.subr.bf16.mxu1 %v373_v0  ;;  %343 = vmatprep.mubr.msk.bf16.mxu1 %vm374_vm1, %v373_v0  ;;  %v363_v7 = vld [vmem:[%s474_s3 + $0x28] sm:$0xff]   ;;  %v365_v9 = vld [vmem:[%s474_s3 + $0x18] sm:$0xff]  }
   0x3   :  { %v28_v4 = vpack.c.bf16 %v27_v2, %v27_v2  ;;  %322 = vmatpush3.bf16.msra.mxu0 %v43_v3  ;;  %328 = vmatpush3.bf16.msra.mxu1 %v361_v5  ;;  %v364_v8 = vld [vmem:[%s474_s3 + $0x20] sm:$0xff]   ;;  %v366_v10 = vld [vmem:[%s474_s3 + $0x10] sm:$0xff]   ;;  %v367_v11 = vld [vmem:[%s474_s3 + $0x8] sm:$0xff]  }
   0x4   :  { %347 = vmatprep.subr.bf16.mxu0 %v373_v0  ;;  %329 = vmatprep.subr.bf16.mxu1 %v373_v0  ;;  %v368_v12 = vld [vmem:[%s474_s3] sm:$0xff]   ;;  %v369_v13 = vld [vmem:[%s475_s5 + $0x18] sm:$0xff]   ;;  %v370_v14 = vld [vmem:[%s475_s5 + $0x10] sm:$0xff]  }
   0x5   :  { %v288_v15 = vld [vmem:[%s476_s2] ss:$0 sm:$0xff]  ;;  %v371_v23 = vld [vmem:[%s475_s5 + $0x8] sm:$0xff]  }
   0x6   :  { %324 = vmatmul.mubr.msk.bf16.vlgmr.msra.gmra.mxu0 %vm37_vm2, %v28_v4  ;;  %v372_v24 = vld [vmem:[%s475_s5] sm:$0xff]  }
   0x7   :  { %355 = vmatprep.mubr.msk.bf16.mxu0 %vm374_vm1, %v373_v0  ;;  %330 = vmatpush3.bf16.msra.mxu1 %v362_v6  ;;  %v290_v25 = vld [vmem:[%s477_s4] ss:$0 sm:$0xff] }
   0x8   :  { %331 = vmatprep.subr.bf16.mxu1 %v373_v0  ;;  %348 = vmatpush3.bf16.msra.mxu0 %v369_v13  ;;  %v299_v33 = vld [vmem:[%s478_s6] ss:$0 sm:$0xff] }
   0x9   :  { %349 = vmatprep.subr.bf16.mxu0 %v373_v0 }
   0xb   :  { %332 = vmatpush3.bf16.msra.mxu1 %v363_v7 }
   0xc   :  { %333 = vmatprep.subr.bf16.mxu1 %v373_v0  ;;  %350 = vmatpush3.bf16.msra.mxu0 %v370_v14 }
   0xd   :  { %351 = vmatprep.subr.bf16.mxu0 %v373_v0 }
   0xf   :  { %334 = vmatpush3.bf16.msra.mxu1 %v364_v8 }
  0x10   :  { %335 = vmatprep.subr.bf16.mxu1 %v373_v0  ;;  %352 = vmatpush3.bf16.msra.mxu0 %v371_v23 }
  0x11   :  { %353 = vmatprep.subr.bf16.mxu0 %v373_v0 }
  0x13   :  { %336 = vmatpush3.bf16.msra.mxu1 %v365_v9 }
  0x14   :  { %337 = vmatprep.subr.bf16.mxu1 %v373_v0  ;;  %354 = vmatpush3.bf16.msra.mxu0 %v372_v24 }
  0x17   :  { %338 = vmatpush3.bf16.msra.mxu1 %v366_v10 }
  0x18   :  { %339 = vmatprep.subr.bf16.mxu1 %v373_v0 }
  0x1b   :  { %340 = vmatpush3.bf16.msra.mxu1 %v367_v11 }
  0x1c   :  { %341 = vmatprep.subr.bf16.mxu1 %v373_v0 }
  0x1f   :  { %342 = vmatpush3.bf16.msra.mxu1 %v368_v12 }
  0xc6   :  { %v79_v16 = vpop.f32.mrf.mxu0 }
  0xc7   :  { %v80_v17 = vadd.f32 %v288_v15, %v79_v16 }
  0xc8   :  { %v325_v18 = vpop.f32.mrf.mxu0 }
  0xc9   :  { %v85_v19 = vmax.f32 %v80_v17, 0.0 }
  0xca   :  { %v82_v20 = vpop.f32.mrf.mxu0 }
  0xcb   :  { %v86_v21 = vpack.c.bf16 %v85_v19, %v85_v19 }
  0xcc   :  { %v326_v22 = vpop.f32.mrf.mxu0 }
  0xcd   :  { %344 = vmatmul.mubr.bf16.vlgmr.msra.gmra.mxu1 %v86_v21 }
 0x18d   :  { %v192_v26 = vpop.f32.mrf.mxu1 }
 0x18e   :  { %v193_v27 = vadd.f32 %v290_v25, %v192_v26 }
 0x18f   :  { %v345_v28 = vpop.f32.mrf.mxu1 }
 0x190   :  { %v198_v29 = vmax.f32 %v193_v27, 0.0 }
 0x191   :  { %v195_v30 = vpop.f32.mrf.mxu1 }
 0x192   :  { %v199_v31 = vpack.c.bf16 %v198_v29, %v198_v29 }
 0x193   :  { %v346_v32 = vpop.f32.mrf.mxu1 }
 0x194   :  { %356 = vmatmul.mubr.msk.bf16.vlgmr.msra.gmra.mxu0 %vm239_vm3, %v199_v31 }
 0x254   :  { %v277_v34 = vpop.f32.mrf.mxu0 }
 0x255   :  { %v278_v35 = vadd.f32 %v299_v33, %v277_v34 }
 0x256   :  { %v357_v36 = vpop.f32.mrf.mxu0 }
 0x257   :  { %283 = vst [vmem:[%s479_s7] sm:$0xff] %v278_v35 }
 0x258   :  { %v280_v37 = vpop.f32.mrf.mxu0 }
 0x25a   :  { %v358_v38 = vpop.f32.mrf.mxu0 }

</bundles_post_ra>
